<compile_context>
chip_gen: v6e
topology: v6e:2x2x1
jax: 0.10.0
libtpu: 0.0.40
codegen_flags: <defaults>
</compile_context>

<pallas_src>
import functools
import jax
import jax.numpy as jnp
from jax.experimental import pallas as pl
from jax.experimental.pallas import tpu as pltpu

EXPANSION = 4  # Bottleneck expansion
BN_EPS = 1e-5


def _round_up(x, m):
    return ((x + m - 1) // m) * m


# --------------------------------------------------------------------------
# Pallas kernels
# --------------------------------------------------------------------------

def _conv_mm_kernel(a_ref, b_ref, o_ref, sum_ref, sq_ref):
    """One M-tile of out = A @ B with fused per-column BN statistics.

    a_ref  : (tm, Kp)    bf16 im2col patch tile
    b_ref  : (Kp, Np)    bf16 packed weight (resident, constant index_map)
    o_ref  : (tm, Np)    bf16 conv output tile
    sum_ref: (1, 1, Np)  f32 per-tile column sums   (reduced in JAX)
    sq_ref : (1, 1, Np)  f32 per-tile column sum-sq (reduced in JAX)
    """
    acc = jnp.dot(a_ref[...], b_ref[...], preferred_element_type=jnp.float32)
    o_ref[...] = acc.astype(o_ref.dtype)
    sum_ref[0] = jnp.sum(acc, axis=0, keepdims=True)
    sq_ref[0] = jnp.sum(acc * acc, axis=0, keepdims=True)


def _affine_kernel(x_ref, s_ref, b_ref, o_ref, *, relu):
    y = x_ref[...].astype(jnp.float32) * s_ref[...] + b_ref[...]
    if relu:
        y = jnp.maximum(y, 0.0)
    o_ref[...] = y.astype(o_ref.dtype)


def _affine_res_kernel(x_ref, s_ref, b_ref, r_ref, o_ref, *, relu):
    y = (x_ref[...].astype(jnp.float32) * s_ref[...] + b_ref[...]
         + r_ref[...].astype(jnp.float32))
    if relu:
        y = jnp.maximum(y, 0.0)
    o_ref[...] = y.astype(o_ref.dtype)


def _maxpool_kernel(p_ref, o_ref):
    # p_ref: (P, tm, C) stacked window taps -> running max over taps
    o_ref[...] = jnp.max(p_ref[...], axis=0)


# --------------------------------------------------------------------------
# Tile-size selection (VMEM-budget aware, safe under v5e 16 MiB default)
# --------------------------------------------------------------------------

def _pick_tm(M, Kp, Np, budget=12 * 1024 * 1024):
    tm = min(512, _round_up(M, 8))
    w_bytes = 2 * Kp * Np * 2                 # resident bf16 weight, x2 buffers
    per_row = 4 * Kp + 16 * Np                # A/out (bf16, x2) + f32 acc/temps
    while tm > 8 and w_bytes + tm * per_row > budget:
        tm = _round_up(max(8, tm // 2), 8)
    return tm


def _pick_rows(Mp, Cp, budget=12 * 1024 * 1024):
    # rows per affine/BN tile: must divide Mp, be a multiple of 8, and keep
    # x / residual / out (bf16, double-buffered) + f32 temporaries in budget.
    for cand in (Mp, 4096, 2048, 1024, 512, 256, 128, 64, 32, 16, 8):
        if (cand <= Mp and Mp % cand == 0 and cand % 8 == 0
                and cand * Cp * 24 <= budget):
            return cand
    return 8


# --------------------------------------------------------------------------
# Pallas wrappers
# --------------------------------------------------------------------------

def pallas_conv_matmul(a, b_packed):
    """a: (M, K) bf16 patches; b_packed: (Kp, Np) bf16 (pre-padded weight).

    Returns the padded (Mp, Np) bf16 output plus f32 column sum / sum-of-
    squares over the M valid rows (padded rows of A are zero, so they do
    not perturb the statistics).
    """
    M, K = a.shape
    Kp, Np = b_packed.shape
    tm = _pick_tm(M, Kp, Np)
    Mp = _round_up(M, tm)
    a_p = jnp.pad(a, ((0, Mp - M), (0, Kp - K)))
    n_tiles = Mp // tm

    out, psum, psq = pl.pallas_call(
        _conv_mm_kernel,
        out_shape=(jax.ShapeDtypeStruct((Mp, Np), jnp.bfloat16),
                   jax.ShapeDtypeStruct((n_tiles, 1, Np), jnp.float32),
                   jax.ShapeDtypeStruct((n_tiles, 1, Np), jnp.float32)),
        grid_spec=pltpu.PrefetchScalarGridSpec(
            num_scalar_prefetch=0,
            grid=(n_tiles,),
            in_specs=[pl.BlockSpec((tm, Kp), lambda i: (i, 0)),
                      pl.BlockSpec((Kp, Np), lambda i: (0, 0))],
            out_specs=(pl.BlockSpec((tm, Np), lambda i: (i, 0)),
                       pl.BlockSpec((1, 1, Np), lambda i: (i, 0, 0)),
                       pl.BlockSpec((1, 1, Np), lambda i: (i, 0, 0)))),
        compiler_params=pltpu.CompilerParams(
            dimension_semantics=("parallel",)),
    )(a_p, b_packed)

    col_sum = jnp.sum(psum[:, 0, :], axis=0)
    col_sq = jnp.sum(psq[:, 0, :], axis=0)
    return out, col_sum, col_sq


def _im2col(x, kh, kw, stride, padding, dilation):
    N, H, W, C = x.shape
    OH = (H + 2 * padding - dilation * (kh - 1) - 1) // stride + 1
    OW = (W + 2 * padding - dilation * (kw - 1) - 1) // stride + 1
    if kh == 1 and kw == 1 and padding == 0:
        if stride > 1:
            x = x[:, ::stride, ::stride, :]
        return x.reshape(N * OH * OW, C), (N, OH, OW)
    xp = jnp.pad(x, ((0, 0), (padding, padding), (padding, padding), (0, 0)))
    cols = []
    for i in range(kh):
        for j in range(kw):
            hs, ws = i * dilation, j * dilation
            cols.append(xp[:, hs:hs + stride * (OH - 1) + 1:stride,
                           ws:ws + stride * (OW - 1) + 1:stride, :])
    patches = jnp.concatenate(cols, axis=-1)          # (N, OH, OW, kh*kw*C)
    return patches.reshape(N * OH * OW, kh * kw * C), (N, OH, OW)


def conv_bn(x_nhwc, conv_p, gamma, beta, *, stride=1, padding=0, dilation=1,
            relu=False, residual=None):
    """Conv (bias-free) + training-mode BatchNorm2d (+ReLU, +residual-add),
    with BN statistics fused into the matmul epilogue."""
    kh, kw, cout = conv_p["kh"], conv_p["kw"], conv_p["cout"]
    patches, (N, OH, OW) = _im2col(x_nhwc, kh, kw, stride, padding, dilation)
    out_p, col_sum, col_sq = pallas_conv_matmul(patches, conv_p["w"])

    M = N * OH * OW
    Mp, Np = out_p.shape

    # Batch statistics (biased variance, like PyTorch BN normalization).
    # Stats are taken from the f32 accumulator; E[x^2]-E[x]^2 in f32 is
    # adequate at this scale (fresh kaiming init, BN renormalizes each layer).
    mean = col_sum[:cout] / M
    var = jnp.maximum(col_sq[:cout] / M - mean * mean, 0.0)
    scale = gamma / jnp.sqrt(var + BN_EPS)
    shift = beta - mean * scale
    scale_p = jnp.pad(scale, (0, Np - cout)).reshape(1, Np)
    shift_p = jnp.pad(shift, (0, Np - cout)).reshape(1, Np)

    tr = _pick_rows(Mp, Np)
    row_spec = pl.BlockSpec((tr, Np), lambda i: (i, 0))
    ch_spec = pl.BlockSpec((1, Np), lambda i: (0, 0))

    if residual is None:
        kern = functools.partial(_affine_kernel, relu=relu)
        operands = (out_p, scale_p, shift_p)
        in_specs = [row_spec, ch_spec, ch_spec]
    else:
        r_p = jnp.pad(residual.reshape(M, cout).astype(jnp.bfloat16),
                      ((0, Mp - M), (0, Np - cout)))
        kern = functools.partial(_affine_res_kernel, relu=relu)
        operands = (out_p, scale_p, shift_p, r_p)
        in_specs = [row_spec, ch_spec, ch_spec, row_spec]

    y = pl.pallas_call(
        kern,
        out_shape=jax.ShapeDtypeStruct((Mp, Np), jnp.bfloat16),
        grid_spec=pltpu.PrefetchScalarGridSpec(
            num_scalar_prefetch=0,
            grid=(Mp // tr,),
            in_specs=in_specs,
            out_specs=pl.BlockSpec((tr, Np), lambda i: (i, 0))),
        compiler_params=pltpu.CompilerParams(
            dimension_semantics=("parallel",)),
    )(*operands)
    return y[:M, :cout].reshape(N, OH, OW, cout)


def pallas_maxpool(x_nhwc, *, kernel=3, stride=2, padding=1):
    N, H, W, C = x_nhwc.shape
    OH = (H + 2 * padding - kernel) // stride + 1
    OW = (W + 2 * padding - kernel) // stride + 1
    xp = jnp.pad(x_nhwc,
                 ((0, 0), (padding, padding), (padding, padding), (0, 0)),
                 constant_values=-jnp.inf)
    cols = []
    for i in range(kernel):
        for j in range(kernel):
            cols.append(xp[:, i:i + stride * (OH - 1) + 1:stride,
                           j:j + stride * (OW - 1) + 1:stride, :])
    P = kernel * kernel
    M = N * OH * OW
    pat = jnp.stack(cols, axis=0).reshape(P, M, C)      # bf16, stride-2 taps
    tm = min(512, _round_up(M, 8))
    Mp = _round_up(M, tm)
    Cp = _round_up(C, 128)
    pat_p = jnp.pad(pat, ((0, 0), (0, Mp - M), (0, Cp - C)))
    out = pl.pallas_call(
        _maxpool_kernel,
        out_shape=jax.ShapeDtypeStruct((Mp, Cp), jnp.bfloat16),
        grid_spec=pltpu.PrefetchScalarGridSpec(
            num_scalar_prefetch=0,
            grid=(Mp // tm,),
            in_specs=[pl.BlockSpec((P, tm, Cp), lambda i: (0, i, 0))],
            out_specs=pl.BlockSpec((tm, Cp), lambda i: (i, 0))),
        compiler_params=pltpu.CompilerParams(
            dimension_semantics=("parallel",)),
    )(pat_p)
    return out[:M, :C].reshape(N, OH, OW, C)


# --------------------------------------------------------------------------
# Parameter init (deterministic; weights pre-packed/padded/cast once)
# --------------------------------------------------------------------------

def _conv_param(key, kh, kw, cin, cout):
    # kaiming_normal_ (fan_in, gain=sqrt(2)); packed as (Kp, Np) bf16
    std = (2.0 / (cin * kh * kw)) ** 0.5
    w = std * jax.random.normal(key, (kh, kw, cin, cout), jnp.float32)
    K = kh * kw * cin
    Kp, Np = _round_up(K, 128), _round_up(cout, 128)
    w2d = jnp.pad(w.reshape(K, cout), ((0, Kp - K), (0, Np - cout)))
    return {"w": w2d.astype(jnp.bfloat16), "kh": kh, "kw": kw, "cout": cout}


def init_resnet_params(key, layers):
    ks = iter(jax.random.split(key, 512))
    params = {
        "conv1": _conv_param(next(ks), 7, 7, 4, 64),
        "bn1_g": jnp.ones((64,), jnp.float32),
        "bn1_b": jnp.zeros((64,), jnp.float32),
    }
    inplanes = 64
    stage_cfg = [(64, layers[0], 1, 1), (128, layers[1], 2, 1),
                 (256, layers[2], 2, 2), (512, layers[3], 2, 2)]
    stages = []
    for planes, blocks, stride, dilation in stage_cfg:
        blk_list = []
        for bidx in range(blocks):
            s = stride if bidx == 0 else 1
            d = dilation if bidx == 0 else 1
            needs_ds = (bidx == 0) and (stride != 1 or
                                        inplanes != planes * EXPANSION)
            bp = {
                "w1": _conv_param(next(ks), 1, 1, inplanes, planes),
                "g1": jnp.ones((planes,), jnp.float32),
                "b1": jnp.zeros((planes,), jnp.float32),
                "w2": _conv_param(next(ks), 3, 3, planes, planes),
                "g2": jnp.ones((planes,), jnp.float32),
                "b2": jnp.zeros((planes,), jnp.float32),
                "w3": _conv_param(next(ks), 1, 1, planes, planes * EXPANSION),
                "g3": jnp.ones((planes * EXPANSION,), jnp.float32),
                "b3": jnp.zeros((planes * EXPANSION,), jnp.float32),
                "stride": s,
                "dilation": d,
            }
            if needs_ds:
                bp["wd"] = _conv_param(next(ks), 1, 1, inplanes,
                                       planes * EXPANSION)
                bp["gd"] = jnp.ones((planes * EXPANSION,), jnp.float32)
                bp["bd"] = jnp.zeros((planes * EXPANSION,), jnp.float32)
            blk_list.append(bp)
            inplanes = planes * EXPANSION
        stages.append(blk_list)
    params["stages"] = stages
    return params


# --------------------------------------------------------------------------
# Forward pass
# --------------------------------------------------------------------------

def bottleneck_forward(x, bp):
    s, d = bp["stride"], bp["dilation"]
    conv2_stride = s if d == 1 else 1
    ds_stride = s if d == 1 else 1

    if "wd" in bp:
        res = conv_bn(x, bp["wd"], bp["gd"], bp["bd"],
                      stride=ds_stride, padding=0, relu=False)
    else:
        res = x

    out = conv_bn(x, bp["w1"], bp["g1"], bp["b1"],
                  stride=1, padding=0, relu=True)
    out = conv_bn(out, bp["w2"], bp["g2"], bp["b2"],
                  stride=conv2_stride, padding=d, dilation=d, relu=True)
    # conv3 + bn3 + residual add + relu, all in one conv_bn (fused epilogue)
    out = conv_bn(out, bp["w3"], bp["g3"], bp["b3"],
                  stride=1, padding=0, relu=True, residual=res)
    return out


def resnet_forward(x_nchw, params):
    skip1 = x_nchw                                   # skip_connection1 = x
    x = jnp.transpose(x_nchw, (0, 2, 3, 1)).astype(jnp.bfloat16)  # -> NHWC

    h = conv_bn(x, params["conv1"], params["bn1_g"], params["bn1_b"],
                stride=2, padding=3, relu=True)      # conv_1 + bn1 + relu
    skip2 = jnp.transpose(h, (0, 3, 1, 2)).astype(jnp.float32)

    h = pallas_maxpool(h, kernel=3, stride=2, padding=1)

    for bp in params["stages"][0]:                   # layer1
        h = bottleneck_forward(h, bp)
    skip3 = jnp.transpose(h, (0, 3, 1, 2)).astype(jnp.float32)

    for stage in params["stages"][1:]:               # layer2..layer4
        for bp in stage:
            h = bottleneck_forward(h, bp)

    out = jnp.transpose(h, (0, 3, 1, 2)).astype(jnp.float32)   # back to NCHW
    return out, skip1, skip2, skip3


# --------------------------------------------------------------------------

if __name__ == "__main__":
    key = jax.random.PRNGKey(0)
    k_x, k_p = jax.random.split(key)
    x = jax.random.normal(k_x, (2, 4, 16, 16), jnp.float32)   # NCHW input
    params = init_resnet_params(k_p, layers=(1, 1, 1, 1))

    out, s1, s2, s3 = resnet_forward(x, params)
    jax.block_until_ready((out, s1, s2, s3))

    assert out.shape == (2, 2048, 2, 2)
    assert s1.shape == (2, 4, 16, 16)
    assert s2.shape == (2, 64, 8, 8)
    assert s3.shape == (2, 256, 4, 4)
    print("KERNEL_OK")
</pallas_src>

<mosaic_0001>
module attributes {stable_mosaic.version = 11 : i64} {
  func.func @_conv_mm_kernel(%arg0: i32, %arg1: memref<128x256xbf16, #tpu.memory_space<vmem>>, %arg2: memref<256x128xbf16, #tpu.memory_space<vmem>>, %arg3: memref<128x128xbf16, #tpu.memory_space<vmem>>, %arg4: memref<1x1x128xf32, #tpu.memory_space<vmem>>, %arg5: memref<1x1x128xf32, #tpu.memory_space<vmem>>) attributes {dimension_semantics = [#tpu.dimension_semantics<parallel>], iteration_bounds = array<i64: 1>, scalar_prefetch = 0 : i64, scratch_operands = 0 : i64, tpu.core_type = #tpu.core_type<tc>, window_params = [{transform_indices = @transform_0, window_bounds = array<i64: 128, 256>}, {pipeline_mode = #tpu.pipeline_mode<synchronous>, transform_indices = @transform_1, window_bounds = array<i64: 256, 128>}, {transform_indices = @transform_2, window_bounds = array<i64: 128, 128>}, {transform_indices = @transform_3, window_bounds = array<i64: 1, 1, 128>}, {transform_indices = @transform_4, window_bounds = array<i64: 1, 1, 128>}]} {
    %c0 = arith.constant 0 : index
    %c0_0 = arith.constant 0 : index
    %0 = vector.load %arg1[%c0, %c0_0] : memref<128x256xbf16, #tpu.memory_space<vmem>>, vector<128x256xbf16>
    %c0_1 = arith.constant 0 : index
    %c0_2 = arith.constant 0 : index
    %1 = vector.load %arg2[%c0_1, %c0_2] : memref<256x128xbf16, #tpu.memory_space<vmem>>, vector<256x128xbf16>
    %cst = arith.constant dense<0.000000e+00> : vector<128x128xf32>
    %2 = tpu.matmul %0, %1, %cst {dimension_numbers = #tpu.dot_dimension_numbers<[1], [0], [0], [1], [0, 0, 1, 1], [], []>} : vector<128x256xbf16>, vector<256x128xbf16>, vector<128x128xf32> -> vector<128x128xf32>
    %3 = arith.truncf %2 : vector<128x128xf32> to vector<128x128xbf16>
    %c0_3 = arith.constant 0 : index
    %c0_4 = arith.constant 0 : index
    %4 = vector.load %arg3[%c0_3, %c0_4] : memref<128x128xbf16, #tpu.memory_space<vmem>>, vector<128x128xbf16>
    tpu.vector_store %arg3[%c0_3, %c0_4], %3 {strides = array<i32>} : memref<128x128xbf16, #tpu.memory_space<vmem>>, vector<128x128xbf16>,
    %cst_5 = arith.constant dense<0.000000e+00> : vector<128xf32>
    %5 = vector.multi_reduction <add>, %2, %cst_5 [0] : vector<128x128xf32> to vector<128xf32>
    %6 = vector.shape_cast %5 : vector<128xf32> to vector<1x128xf32>
    %c0_6 = arith.constant 0 : index
    %c0_7 = arith.constant 0 : index
    %c0_8 = arith.constant 0 : index
    %7 = vector.load %arg4[%c0_6, %c0_7, %c0_8] : memref<1x1x128xf32, #tpu.memory_space<vmem>>, vector<1x1x128xf32>
    %8 = vector.shape_cast %7 : vector<1x1x128xf32> to vector<1x128xf32>
    %9 = vector.shape_cast %6 : vector<1x128xf32> to vector<1x1x128xf32>
    tpu.vector_store %arg4[%c0_6, %c0_7, %c0_8], %9 {strides = array<i32>} : memref<1x1x128xf32, #tpu.memory_space<vmem>>, vector<1x1x128xf32>,
    %10 = arith.mulf %2, %2 : vector<128x128xf32>
    %cst_9 = arith.constant dense<0.000000e+00> : vector<128xf32>
    %11 = vector.multi_reduction <add>, %10, %cst_9 [0] : vector<128x128xf32> to vector<128xf32>
    %12 = vector.shape_cast %11 : vector<128xf32> to vector<1x128xf32>
    %c0_10 = arith.constant 0 : index
    %c0_11 = arith.constant 0 : index
    %c0_12 = arith.constant 0 : index
    %13 = vector.load %arg5[%c0_10, %c0_11, %c0_12] : memref<1x1x128xf32, #tpu.memory_space<vmem>>, vector<1x1x128xf32>
    %14 = vector.shape_cast %13 : vector<1x1x128xf32> to vector<1x128xf32>
    %15 = vector.shape_cast %12 : vector<1x128xf32> to vector<1x1x128xf32>
    tpu.vector_store %arg5[%c0_10, %c0_11, %c0_12], %15 {strides = array<i32>} : memref<1x1x128xf32, #tpu.memory_space<vmem>>, vector<1x1x128xf32>,
    return
  }
  func.func @transform_0(%arg0: i32) -> (i32, i32) {
    %c0_i32 = arith.constant 0 : i32
    %c0_i32_0 = arith.constant 0 : i32
    return %arg0, %c0_i32 : i32, i32
  }
  func.func @transform_1(%arg0: i32) -> (i32, i32) {
    %c0_i32 = arith.constant 0 : i32
    %c0_i32_0 = arith.constant 0 : i32
    %c0_i32_1 = arith.constant 0 : i32
    return %c0_i32, %c0_i32_0 : i32, i32
  }
  func.func @transform_2(%arg0: i32) -> (i32, i32) {
    %c0_i32 = arith.constant 0 : i32
    %c0_i32_0 = arith.constant 0 : i32
    return %arg0, %c0_i32 : i32, i32
  }
  func.func @transform_3(%arg0: i32) -> (i32, i32, i32) {
    %c0_i32 = arith.constant 0 : i32
    %c0_i32_0 = arith.constant 0 : i32
    %c0_i32_1 = arith.constant 0 : i32
    return %arg0, %c0_i32, %c0_i32_0 : i32, i32, i32
  }
  func.func @transform_4(%arg0: i32) -> (i32, i32, i32) {
    %c0_i32 = arith.constant 0 : i32
    %c0_i32_0 = arith.constant 0 : i32
    %c0_i32_1 = arith.constant 0 : i32
    return %arg0, %c0_i32, %c0_i32_0 : i32, i32, i32
  }
}

</mosaic_0001>

<bundles_post_ra>
// kernel: tpu_custom_call.1
= control target key start
LH: loop header
LB: loop body
LE: loop exit
PB: predicated region body
PF: predicated region fallthrough
CT: control target
= control target key end

     0   :  { %10 = vsyncpa [#allocation3], 0  ;;  %s984_s0 = inlined_call_operand.hbm [shape: bf16[128,256], index: 0, kind: input, shape index: {}]   ;;  %s985_s1 = inlined_call_operand.hbm [shape: bf16[256,128], index: 1, kind: input, shape index: {}]   ;;  %s986_s2 = inlined_call_operand.hbm [shape: bf16[128,128], index: 2, kind: output, shape index: {0}]   ;;  %s987_s3 = inlined_call_operand.hbm [shape: f32[1,1,128], index: 3, kind: output, shape index: {1}]   ;;  %s988_s4 = inlined_call_operand.hbm [shape: f32[1,1,128], index: 4, kind: output, shape index: {2}]  }
   0x1   :  { %11 = vsyncpa [#allocation6], 0 }
   0x2   :  { %12 = vsyncpa [#allocation4], 0 }
   0x3   :  { %13 = vsyncpa [#allocation9], 0  ;;  %s899_s15 = smov [#allocation2]  }
   0x4   :  { %s19_s16 = sshll.u32 %s899_s15, 4  ;;  %s20_s16 = int_to_ptr.vmem [resolvable:$true] %s19_s16 }
   0x5   :  { %s799_s17 = scalar_lea.vmem %s20_s16, 2048  ;;  %p804_p1 = scmp.lt.s32.totalorder %s20_s16, %s20_s16 }
   0x6   :  { %p800_p0 = scmp.ne.s32.totalorder %s20_s16, %s799_s17  ;;  %p805_p2 = scmp.lt.s32.totalorder %s799_s17, %s799_s17 }
   0x8   :  { %p806_p3 = por %p805_p2, %p804_p1 }
   0xa   :  { %p807_p4 = pnand %p806_p3, %p800_p0 }
   0xc   :  { %810 = shalt.err (!%p807_p4)
}
   0xd   :  { %s900_s18 = smov 128   ;;  %s901_s19 = smov 8  }
   0xe   :  { %25 = dma.hbm_to_vmem [thread:$0]  %s984_s0, 2048, %s20_s16, [#allocation3], %s900_s18, %s900_s18, %s901_s19  }
   0xf   :  { %s902_s22 = smov [#allocation5]  }
  0x10   :  { %s31_s23 = sshll.u32 %s902_s22, 4  ;;  %s32_s23 = int_to_ptr.vmem [resolvable:$true] %s31_s23 }
  0x11   :  { %s819_s24 = scalar_lea.vmem %s32_s23, 2048  ;;  %p824_p6 = scmp.lt.s32.totalorder %s32_s23, %s32_s23 }
  0x12   :  { %p820_p5 = scmp.ne.s32.totalorder %s32_s23, %s819_s24  ;;  %p825_p7 = scmp.lt.s32.totalorder %s819_s24, %s819_s24 }
  0x14   :  { %p826_p8 = por %p825_p7, %p824_p6 }
  0x16   :  { %p827_p9 = pnand %p826_p8, %p820_p5 }
  0x18   :  { %830 = shalt.err (!%p827_p9)
}
  0x19   :  { %s903_s25 = smov 64   ;;  %s904_s26 = smov 4  }
  0x1a   :  { %37 = dma.hbm_to_vmem [thread:$0]  %s985_s1, 2048, %s32_s23, [#allocation6], %s903_s25, %s903_s25, %s904_s26  }
  0x1b   :  { %891 = dma.done.wait [#allocation3], 2048  }
  0x1c   :  { %892 = vsyncadd [#allocation3], 4294965248 }
  0x1d   :  { %893 = dma.done.wait [#allocation6], 2048  }
  0x1e   :  { %894 = vsyncadd [#allocation6], 4294965248  ;;  %v751_v0 = vld [vmem:[#allocation5 + $0x78] sm:$0xff]   ;;  %v753_v2 = vld [vmem:[#allocation5 + $0x70] sm:$0xff]   ;;  %s905_s0 = smov [#allocation7]  }
  0x1f   :  { %v752_v1 = vld [vmem:[#allocation5 + $0x38] sm:$0xff]   ;;  %662 = vmatprep.subr.bf16.mxu0 %v751_v0  ;;  %726 = vmatprep.subr.bf16.mxu1 %v751_v0  ;;  %v754_v3 = vld [vmem:[#allocation5 + $0x30] sm:$0xff]   ;;  %v755_v4 = vld [vmem:[#allocation5 + $0x68] sm:$0xff]   ;;  %s511_s1 = sshll.u32 %s905_s0, 4  ;;  %s512_s1 = int_to_ptr.vmem [resolvable:$true] %s511_s1 }
  0x20   :  { %663 = vmatpush3.bf16.msra.mxu0 %v752_v1  ;;  %734 = vmatpush3.bf16.msra.mxu1 %v752_v1  ;;  %v756_v5 = vld [vmem:[#allocation5 + $0x28] sm:$0xff]   ;;  %v757_v6 = vld [vmem:[#allocation5 + $0x60] sm:$0xff]   ;;  %v759_v8 = vld [vmem:[#allocation5 + $0x58] sm:$0xff]   ;;  %s831_s29 = scalar_lea.vmem %s512_s1, 1024  ;;  %p836_p11 = scmp.lt.s32.totalorder %s512_s1, %s512_s1 }
  0x21   :  { %664 = vmatprep.subr.bf16.mxu0 %v753_v2  ;;  %727 = vmatprep.subr.bf16.mxu1 %v753_v2  ;;  %v758_v7 = vld [vmem:[#allocation5 + $0x20] sm:$0xff]   ;;  %v760_v9 = vld [vmem:[#allocation5 + $0x18] sm:$0xff]   ;;  %v761_v10 = vld [vmem:[#allocation5 + $0x50] sm:$0xff]   ;;  %p832_p10 = scmp.ne.s32.totalorder %s512_s1, %s831_s29  ;;  %p837_p12 = scmp.lt.s32.totalorder %s831_s29, %s831_s29 }
  0x22   :  { %v769_v11 = vld [vmem:[#allocation2 + $0x4] ss:$8 sps:$4 sm:$0xff]   ;;  %v762_v12 = vld [vmem:[#allocation5 + $0x10] sm:$0xff]   ;;  %v767_v18 = vld [vmem:[#allocation2] ss:$8 sps:$4 sm:$0xff]  }
  0x23   :  { %v775_v13 = vld [vmem:[#allocation2 + $0x44] ss:$8 sps:$4 sm:$0xff]   ;;  %301 = vmatprep.mubr.bf16.mxu0 %v769_v11  ;;  %v773_v19 = vld [vmem:[#allocation2 + $0x40] ss:$8 sps:$4 sm:$0xff]   ;;  %v770_v20 = vld [vmem:[#allocation2 + $0x14] ss:$8 sps:$4 sm:$0xff]   ;;  %p838_p13 = por %p837_p12, %p836_p11 }
  0x24   :  { %665 = vmatpush3.bf16.msra.mxu0 %v754_v3  ;;  %735 = vmatpush3.bf16.msra.mxu1 %v754_v3  ;;  %v763_v14 = vld [vmem:[#allocation5 + $0x48] sm:$0xff]   ;;  %v765_v16 = vld [vmem:[#allocation5 + $0x40] sm:$0xff]   ;;  %v779_v21 = vld [vmem:[#allocation2 + $0x54] ss:$8 sps:$4 sm:$0xff]  }
  0x25   :  { %666 = vmatprep.subr.bf16.mxu0 %v755_v4  ;;  %728 = vmatprep.subr.bf16.mxu1 %v755_v4  ;;  %v764_v15 = vld [vmem:[#allocation5 + $0x8] sm:$0xff]   ;;  %v766_v17 = vld [vmem:[#allocation5] sm:$0xff]   ;;  %v772_v22 = vld [vmem:[#allocation2 + $0x10] ss:$8 sps:$4 sm:$0xff]   ;;  %p839_p0 = pnand %p838_p13, %p832_p10 }
  0x26   :  { %333 = vmatprep.mubr.bf16.mxu1 %v775_v13  ;;  %v781_v23 = vld [vmem:[#allocation2 + $0x50] ss:$8 sps:$4 sm:$0xff]   ;;  %v776_v24 = vld [vmem:[#allocation2 + $0x24] ss:$8 sps:$4 sm:$0xff]   ;;  %v778_v26 = vld [vmem:[#allocation2 + $0x20] ss:$8 sps:$4 sm:$0xff]  }
  0x27   :  { %v785_v25 = vld [vmem:[#allocation2 + $0x64] ss:$8 sps:$4 sm:$0xff]   ;;  %v787_v27 = vld [vmem:[#allocation2 + $0x60] ss:$8 sps:$4 sm:$0xff]   ;;  %v782_v28 = vld [vmem:[#allocation2 + $0x34] ss:$8 sps:$4 sm:$0xff]  }
  0x28   :  { %667 = vmatpush3.bf16.msra.mxu0 %v756_v5  ;;  %736 = vmatpush3.bf16.msra.mxu1 %v756_v5  ;;  %v788_v29 = vld [vmem:[#allocation2 + $0x74] ss:$8 sps:$4 sm:$0xff]   ;;  %v784_v30 = vld [vmem:[#allocation2 + $0x30] ss:$8 sps:$4 sm:$0xff]  }
  0x29   :  { %668 = vmatprep.subr.bf16.mxu0 %v757_v6  ;;  %729 = vmatprep.subr.bf16.mxu1 %v757_v6  ;;  %v790_v31 = vld [vmem:[#allocation2 + $0x70] ss:$8 sps:$4 sm:$0xff]  }
  0x2c   :  { %669 = vmatpush3.bf16.msra.mxu0 %v758_v7  ;;  %737 = vmatpush3.bf16.msra.mxu1 %v758_v7 }
  0x2d   :  { %670 = vmatprep.subr.bf16.mxu0 %v759_v8  ;;  %730 = vmatprep.subr.bf16.mxu1 %v759_v8 }
  0x30   :  { %671 = vmatpush3.bf16.msra.mxu0 %v760_v9  ;;  %738 = vmatpush3.bf16.msra.mxu1 %v760_v9 }
  0x31   :  { %672 = vmatprep.subr.bf16.mxu0 %v761_v10  ;;  %731 = vmatprep.subr.bf16.mxu1 %v761_v10 }
  0x34   :  { %673 = vmatpush3.bf16.msra.mxu0 %v762_v12  ;;  %739 = vmatpush3.bf16.msra.mxu1 %v762_v12 }
  0x35   :  { %674 = vmatprep.subr.bf16.mxu0 %v763_v14  ;;  %732 = vmatprep.subr.bf16.mxu1 %v763_v14 }
  0x38   :  { %675 = vmatpush3.bf16.msra.mxu0 %v764_v15  ;;  %740 = vmatpush3.bf16.msra.mxu1 %v764_v15 }
  0x39   :  { %676 = vmatprep.subr.bf16.mxu0 %v765_v16  ;;  %733 = vmatprep.subr.bf16.mxu1 %v765_v16 }
  0x3c   :  { %677 = vmatpush3.bf16.msra.mxu0 %v766_v17  ;;  %741 = vmatpush3.bf16.msra.mxu1 %v766_v17 }
  0x3f   :  { %302 = vmatmul.mubr.bf16.vlgmr.msra.gmra.mxu0 %v767_v18  ;;  %334 = vmatmul.mubr.bf16.vlgmr.msra.gmra.mxu1 %v773_v19 }
  0x40   :  { %309 = vmatprep.mubr.bf16.mxu0 %v770_v20  ;;  %341 = vmatprep.mubr.bf16.mxu1 %v779_v21 }
  0x47   :  { %310 = vmatmul.mubr.bf16.gmra.mxu0 %v772_v22  ;;  %342 = vmatmul.mubr.bf16.gmra.mxu1 %v781_v23 }
  0x48   :  { %317 = vmatprep.mubr.bf16.mxu0 %v776_v24  ;;  %349 = vmatprep.mubr.bf16.mxu1 %v785_v25 }
  0x4f   :  { %318 = vmatmul.mubr.bf16.gmra.mxu0 %v778_v26  ;;  %350 = vmatmul.mubr.bf16.gmra.mxu1 %v787_v27 }
  0x50   :  { %325 = vmatprep.mubr.bf16.mxu0 %v782_v28  ;;  %357 = vmatprep.mubr.bf16.mxu1 %v788_v29 }
  0x57   :  { %326 = vmatmul.mubr.bf16.gmra.mxu0 %v784_v30  ;;  %358 = vmatmul.mubr.bf16.gmra.mxu1 %v790_v31 }
  0xff   :  { %v678_v32 = vpop.f32.mrf.mxu0  ;;  %v702_v33 = vpop.f32.mrf.mxu1 }
 0x101   :  { %v679_v34 = vpop.f32.mrf.mxu0  ;;  %v703_v35 = vpop.f32.mrf.mxu1 }
 0x102   :  { %v942_v38 = vadd.f32 %v703_v35, %v702_v33  ;;  %v680_v41 = vadd.f32 %v679_v34, %v678_v32 }
 0x103   :  { %v681_v36 = vpop.f32.mrf.mxu0  ;;  %v705_v37 = vpop.f32.mrf.mxu1 }
 0x104   :  { %v468_v1 = vmul.f32 %v680_v41, %v680_v41 }
 0x105   :  { %v682_v39 = vpop.f32.mrf.mxu0  ;;  %v706_v40 = vpop.f32.mrf.mxu1 }
 0x106   :  { %v683_v42 = vadd.f32 %v682_v39, %v681_v36  ;;  %v944_v43 = vadd.f32 %v706_v40, %v705_v37 }
 0x107   :  { %v684_v44 = vpop.f32.mrf.mxu0  ;;  %v708_v45 = vpop.f32.mrf.mxu1 }
 0x108   :  { %v618_v46 = vpack.c.bf16 %v683_v42, %v680_v41  ;;  %v638_v47 = vpack.c.bf16 %v944_v43, %v942_v38  ;;  %v469_v62 = vmul.f32 %v683_v42, %v683_v42  ;;  %v446_v6 = vadd.f32 %v683_v42, %v680_v41 }
 0x109   :  { %v685_v48 = vpop.f32.mrf.mxu0  ;;  %v709_v49 = vpop.f32.mrf.mxu1 }
 0x10a   :  { %619 = vst [vmem:[#allocation7] sm:$0xff] %v618_v46   ;;  %658 = vst [vmem:[#allocation7 + $0x20] sm:$0xff] %v638_v47   ;;  %v948_v52 = vadd.f32 %v709_v49, %v708_v45  ;;  %v686_v55 = vadd.f32 %v685_v48, %v684_v44  ;;  %v484_v8 = vadd.f32 %v469_v62, %v468_v1 }
 0x10b   :  { %v687_v50 = vpop.f32.mrf.mxu0  ;;  %v711_v51 = vpop.f32.mrf.mxu1  ;;  %v476_v47 = vmul.f32 %v942_v38, %v942_v38 }
 0x10c   :  { %v470_v2 = vmul.f32 %v686_v55, %v686_v55  ;;  %v447_v12 = vadd.f32 %v686_v55, %v446_v6 }
 0x10d   :  { %v688_v53 = vpop.f32.mrf.mxu0  ;;  %v712_v54 = vpop.f32.mrf.mxu1 }
 0x10e   :  { %v689_v56 = vadd.f32 %v688_v53, %v687_v50  ;;  %v950_v57 = vadd.f32 %v712_v54, %v711_v51  ;;  %v485_v15 = vadd.f32 %v484_v8, %v470_v2 }
 0x10f   :  { %v690_v58 = vpop.f32.mrf.mxu0  ;;  %v714_v59 = vpop.f32.mrf.mxu1 }
 0x110   :  { %v623_v60 = vpack.c.bf16 %v689_v56, %v686_v55  ;;  %v643_v61 = vpack.c.bf16 %v950_v57, %v948_v52  ;;  %v471_v9 = vmul.f32 %v689_v56, %v689_v56  ;;  %v448_v19 = vadd.f32 %v689_v56, %v447_v12 }
 0x111   :  { %v691_v63 = vpop.f32.mrf.mxu0  ;;  %v715_v0 = vpop.f32.mrf.mxu1 }
 0x112   :  { %655 = vst [vmem:[#allocation7 + $0x8] sm:$0xff] %v623_v60   ;;  %659 = vst [vmem:[#allocation7 + $0x28] sm:$0xff] %v643_v61   ;;  %v692_v3 = vadd.f32 %v691_v63, %v690_v58  ;;  %v954_v7 = vadd.f32 %v715_v0, %v714_v59  ;;  %v486_v22 = vadd.f32 %v485_v15, %v471_v9 }
 0x113   :  { %v693_v4 = vpop.f32.mrf.mxu0  ;;  %v717_v5 = vpop.f32.mrf.mxu1 }
 0x114   :  { %v472_v16 = vmul.f32 %v692_v3, %v692_v3  ;;  %v449_v26 = vadd.f32 %v692_v3, %v448_v19 }
 0x115   :  { %v694_v10 = vpop.f32.mrf.mxu0  ;;  %v718_v11 = vpop.f32.mrf.mxu1 }
 0x116   :  { %v695_v13 = vadd.f32 %v694_v10, %v693_v4  ;;  %v719_v14 = vadd.f32 %v718_v11, %v717_v5  ;;  %v487_v28 = vadd.f32 %v486_v22, %v472_v16 }
 0x117   :  { %v696_v17 = vpop.f32.mrf.mxu0  ;;  %v720_v18 = vpop.f32.mrf.mxu1 }
 0x118   :  { %v628_v20 = vpack.c.bf16 %v695_v13, %v692_v3  ;;  %v648_v21 = vpack.c.bf16 %v719_v14, %v954_v7  ;;  %v473_v23 = vmul.f32 %v695_v13, %v695_v13  ;;  %v450_v31 = vadd.f32 %v695_v13, %v449_v26 }
 0x119   :  { %v697_v24 = vpop.f32.mrf.mxu0  ;;  %v721_v25 = vpop.f32.mrf.mxu1 }
 0x11a   :  { %656 = vst [vmem:[#allocation7 + $0x10] sm:$0xff] %v628_v20   ;;  %v698_v27 = vadd.f32 %v697_v24, %v696_v17  ;;  %660 = vst [vmem:[#allocation7 + $0x30] sm:$0xff] %v648_v21   ;;  %v722_v33 = vadd.f32 %v721_v25, %v720_v18  ;;  %v488_v34 = vadd.f32 %v487_v28, %v473_v23 }
 0x11b   :  { %v699_v29 = vpop.f32.mrf.mxu0  ;;  %v723_v30 = vpop.f32.mrf.mxu1 }
 0x11c   :  { %v474_v32 = vmul.f32 %v698_v27, %v698_v27  ;;  %v451_v37 = vadd.f32 %v698_v27, %v450_v31 }
 0x11d   :  { %v700_v35 = vpop.f32.mrf.mxu0  ;;  %v724_v36 = vpop.f32.mrf.mxu1 }
 0x11e   :  { %v701_v39 = vadd.f32 %v700_v35, %v699_v29  ;;  %v725_v40 = vadd.f32 %v724_v36, %v723_v30  ;;  %v489_v41 = vadd.f32 %v488_v34, %v474_v32 }
 0x120   :  { %v633_v42 = vpack.c.bf16 %v701_v39, %v698_v27  ;;  %v452_v44 = vadd.f32 %v701_v39, %v451_v37  ;;  %v475_v45 = vmul.f32 %v701_v39, %v701_v39  ;;  %v653_v46 = vpack.c.bf16 %v725_v40, %v722_v33 }
 0x122   :  { %657 = vst [vmem:[#allocation7 + $0x18] sm:$0xff] %v633_v42   ;;  %v453_v48 = vadd.f32 %v942_v38, %v452_v44  ;;  %v490_v49 = vadd.f32 %v489_v41, %v475_v45  ;;  %661 = vst [vmem:[#allocation7 + $0x38] sm:$0xff] %v653_v46  }
 0x123   :  { %842 = shalt.err (!%p839_p0)
}
 0x124   :  { %517 = dma.vmem_to_hbm [thread:$0]  %s512_s1, 1024, %s986_s2, [#allocation4], %s903_s25, %s903_s25, %s904_s26   ;;  %v477_v50 = vmul.f32 %v944_v43, %v944_v43  ;;  %v454_v38 = vadd.f32 %v944_v43, %v453_v48  ;;  %v491_v51 = vadd.f32 %v490_v49, %v476_v47  ;;  %v478_v53 = vmul.f32 %v948_v52, %v948_v52 }
 0x125   :  { %v479_v56 = vmul.f32 %v950_v57, %v950_v57  ;;  %v480_v60 = vmul.f32 %v954_v7, %v954_v7  ;;  %v481_v63 = vmul.f32 %v719_v14, %v719_v14  ;;  %v482_v3 = vmul.f32 %v722_v33, %v722_v33  ;;  %s906_s2 = smov [#allocation8]   ;;  %s907_s7 = smov [#allocation10]  }
 0x126   :  { %v492_v54 = vadd.f32 %v491_v51, %v477_v50  ;;  %v455_v55 = vadd.f32 %v948_v52, %v454_v38  ;;  %v483_v5 = vmul.f32 %v725_v40, %v725_v40  ;;  %s524_s6 = sshll.u32 %s906_s2, 4  ;;  %s534_s8 = sshll.u32 %s907_s7, 4  ;;  %s525_s6 = int_to_ptr.vmem [resolvable:$true] %s524_s6  ;;  %s535_s8 = int_to_ptr.vmem [resolvable:$true] %s534_s8 }
 0x127   :  { %s851_s9 = scalar_lea.vmem %s525_s6, 16  ;;  %s855_s10 = scalar_lea.vmem %s525_s6, 32 }
 0x128   :  { %v456_v58 = vadd.f32 %v950_v57, %v455_v55  ;;  %v493_v59 = vadd.f32 %v492_v54, %v478_v53  ;;  %p852_p1 = scmp.ne.s32.totalorder %s525_s6, %s851_s9  ;;  %p856_p2 = scmp.lt.s32.totalorder %s525_s6, %s525_s6 }
 0x129   :  { %p857_p3 = scmp.lt.s32.totalorder %s855_s10, %s851_s9 }
 0x12a   :  { %v457_v61 = vadd.f32 %v954_v7, %v456_v58  ;;  %v494_v62 = vadd.f32 %v493_v59, %v479_v56 }
 0x12b   :  { %p858_p4 = por %p857_p3, %p856_p2 }
 0x12c   :  { %v458_v43 = vadd.f32 %v719_v14, %v457_v61  ;;  %v495_v0 = vadd.f32 %v494_v62, %v480_v60 }
 0x12d   :  { %p859_p5 = pnand %p858_p4, %p852_p1 }
 0x12e   :  { %v496_v1 = vadd.f32 %v495_v0, %v481_v63  ;;  %v459_v2 = vadd.f32 %v722_v33, %v458_v43 }
 0x130   :  { %v497_v4 = vadd.f32 %v496_v1, %v482_v3  ;;  %v460_v52 = vadd.f32 %v725_v40, %v459_v2 }
 0x132   :  { %v461_v6 = vrot.slane %v460_v52, 4  ;;  %v498_v8 = vadd.f32 %v497_v4, %v483_v5 }
 0x134   :  { %v462_v9 = vadd.f32 %v461_v6, %v460_v52  ;;  %v499_v57 = vrot.slane %v498_v8, 4 }
 0x136   :  { %v500_v10 = vadd.f32 %v499_v57, %v498_v8  ;;  %v463_v11 = vrot.slane %v462_v9, 2 }
 0x138   :  { %v464_v12 = vadd.f32 %v463_v11, %v462_v9  ;;  %v501_v13 = vrot.slane %v500_v10, 2 }
 0x13a   :  { %v465_v7 = vrot.slane %v464_v12, 1  ;;  %v502_v15 = vadd.f32 %v501_v13, %v500_v10 }
 0x13c   :  { %v466_v14 = vadd.f32 %v465_v7, %v464_v12  ;;  %v503_v16 = vrot.slane %v502_v15, 1 }
 0x13e   :  { %467 = vst [vmem:[#allocation8] sm:$0x1] %v466_v14  ;;  %v504_v17 = vadd.f32 %v503_v16, %v502_v15 }
 0x13f   :  { %862 = shalt.err (!%p859_p5)
}
 0x140   :  { %527 = dma.vmem_to_hbm [thread:$0]  %s525_s6, 16, %s987_s3, [#allocation9]   ;;  %505 = vst [vmem:[#allocation10] sm:$0x1] %v504_v17 }
 0x141   :  { %s871_s13 = scalar_lea.vmem %s535_s8, 16  ;;  %s875_s14 = scalar_lea.vmem %s535_s8, 32 }
 0x142   :  { %p872_p6 = scmp.ne.s32.totalorder %s535_s8, %s871_s13  ;;  %p876_p7 = scmp.lt.s32.totalorder %s535_s8, %s535_s8 }
 0x143   :  { %p877_p8 = scmp.lt.s32.totalorder %s875_s14, %s871_s13 }
 0x145   :  { %p878_p9 = por %p877_p8, %p876_p7 }
 0x147   :  { %p879_p10 = pnand %p878_p9, %p872_p6 }
 0x149   :  { %882 = shalt.err (!%p879_p10)
}
 0x14a   :  { %537 = dma.vmem_to_hbm [thread:$0]  %s535_s8, 16, %s988_s4, [#allocation9]  }
 0x14b   :  { %895 = dma.done.wait [#allocation4], 1024  }
 0x14c   :  { %896 = vsyncadd [#allocation4], 4294966272 }
 0x14d   :  { %897 = dma.done.wait [#allocation9], 32  }
 0x14e   :  { %898 = vsyncadd [#allocation9], 4294967264 }
 0x14f   :  { %547 = vsyncpa [#allocation3], 1 }
 0x150   :  { %548 = vsyncpa [#allocation6], 1 }
 0x151   :  { %549 = vsyncpa [#allocation4], 1 }
 0x152   :  { %550 = vsyncpa [#allocation9], 1 }

</bundles_post_ra>
